<compile_context>
chip_gen: v7x
topology: tpu7x:2x2x1
jax: 0.10.0
libtpu: 0.0.40
codegen_flags: <defaults>
</compile_context>

<pallas_src>
import jax
import jax.numpy as jnp
from jax.experimental import pallas as pl
from jax.experimental.pallas import tpu as pltpu


_EPS = 1e-12          # torch.nn.functional.normalize eps
_EPS_SQ = _EPS * _EPS


def posezhou_kernel(p_ref, rt_ref, out_ref):
    """p_ref: SMEM f32[9] = [dR0..dR5, dt0..dt2]; rt_ref/out_ref: VMEM f32[4,4]."""
    f32 = jnp.float32
    shape = (4, 4)

    # Broadcast each packed scalar onto a (4,4) vreg; all subsequent math is
    # element-wise VPU work on full vregs (no scalar-core float transcendentals,
    # no cross-lane reductions, no MXU).
    def ld(i):
        return jnp.broadcast_to(p_ref[i], shape)

    # d6 = dR + id, with id = [1,0,0,0,1,0] baked in as constants.
    a1x = ld(0) + 1.0
    a1y = ld(1)
    a1z = ld(2)
    a2x = ld(3)
    a2y = ld(4) + 1.0
    a2z = ld(5)
    t0, t1, t2 = ld(6), ld(7), ld(8)

    # Gram-Schmidt (Zhou 6D -> rotation) kept un-normalized; the normalizing
    # denominators are divided out once at the end.
    n1sq = a1x * a1x + a1y * a1y + a1z * a1z            # ||a1||^2
    d12 = a1x * a2x + a1y * a2y + a1z * a2z             # <a1, a2>
    # (b1 . a2) * b1 == (d12 / max(||a1||, eps)^2) * a1
    s = d12 / jnp.maximum(n1sq, _EPS_SQ)
    w2x = a2x - s * a1x                                 # un-normalized b2
    w2y = a2y - s * a1y
    w2z = a2z - s * a1z
    n2sq = w2x * w2x + w2y * w2y + w2z * w2z            # ||w2||^2
    # cross(a1, w2) == (c1 * c2) * cross(b1, b2)
    u3x = a1y * w2z - a1z * w2y
    u3y = a1z * w2x - a1x * w2z
    u3z = a1x * w2y - a1y * w2x

    c1 = jnp.maximum(jnp.sqrt(n1sq), _EPS)              # max(||a1||, eps)
    c2 = jnp.maximum(jnp.sqrt(n2sq), _EPS)              # max(||w2||, eps)

    # Assemble dRt = [[b1; b2; b3 | dt], [0,0,0,1]] with lane/row masks
    # (no concatenates -> no sub-vreg relayout shuffles).
    lane = jax.lax.broadcasted_iota(jnp.int32, shape, 1)
    row = jax.lax.broadcasted_iota(jnp.int32, shape, 0)

    def lane_sel(x, y, z, w):
        return jnp.where(lane == 0, x,
               jnp.where(lane == 1, y,
               jnp.where(lane == 2, z, w)))

    num = jnp.where(row == 0, lane_sel(a1x, a1y, a1z, t0),
          jnp.where(row == 1, lane_sel(w2x, w2y, w2z, t1),
          jnp.where(row == 2, lane_sel(u3x, u3y, u3z, t2),
                    jnp.where(lane == 3, f32(1.0), f32(0.0)))))

    denom = jnp.where(row == 0, c1,
            jnp.where(row == 1, c2,
            jnp.where(row == 2, c1 * c2, f32(1.0))))
    denom = jnp.where(lane == 3, f32(1.0), denom)       # dt column & bottom row
    dRt = num / denom

    # out = Rt @ dRt, unrolled as 4 broadcast multiply-adds (VPU only, no MXU).
    rt = rt_ref[...]
    out_ref[...] = (rt[:, 0:1] * dRt[0:1, :]
                    + rt[:, 1:2] * dRt[1:2, :]
                    + rt[:, 2:3] * dRt[2:3, :]
                    + rt[:, 3:4] * dRt[3:4, :])


@jax.jit
def pose_zhou_forward(Rt, dR, dt):
    """JAX equivalent of PoseZhou.forward() with is_learnable=True.

    Rt : (4, 4) float32 buffer
    dR : (6,)   float32 parameter (Zhou 6D rotation delta)
    dt : (3,)   float32 parameter (translation delta)
    """
    Rt = jnp.asarray(Rt, jnp.float32)
    params = jnp.concatenate([jnp.asarray(dR, jnp.float32).reshape(6),
                              jnp.asarray(dt, jnp.float32).reshape(3)])
    return pl.pallas_call(
        posezhou_kernel,
        out_shape=jax.ShapeDtypeStruct((4, 4), jnp.float32),
        in_specs=[
            pl.BlockSpec(memory_space=pltpu.MemorySpace.SMEM),   # packed [dR|dt]
            pl.BlockSpec(memory_space=pltpu.MemorySpace.VMEM),   # Rt
        ],
        out_specs=pl.BlockSpec(memory_space=pltpu.MemorySpace.VMEM),
    )(params, Rt)


def _reference_forward(Rt, dR, dt):
    """Pure-JAX reference mirroring the PyTorch module semantics."""
    id6 = jnp.array([1, 0, 0, 0, 1, 0], dtype=jnp.float32)
    d6 = dR + id6
    a1, a2 = d6[:3], d6[3:]
    b1 = a1 / jnp.maximum(jnp.linalg.norm(a1), 1e-12)
    b2 = a2 - jnp.sum(b1 * a2) * b1
    b2 = b2 / jnp.maximum(jnp.linalg.norm(b2), 1e-12)
    b3 = jnp.cross(b1, b2)
    rot = jnp.stack([b1, b2, b3], axis=0)
    top = jnp.concatenate([rot, dt.reshape(3, 1)], axis=1)
    dRt = jnp.concatenate([top, jnp.array([[0.0, 0.0, 0.0, 1.0]])], axis=0)
    return Rt @ dRt


if __name__ == "__main__":
    key = jax.random.PRNGKey(0)
    k1, k2, k3 = jax.random.split(key, 3)

    # Deterministic synthetic module state (module __init__ zero-inits dR/dt
    # and Rt=eye(4); small random perturbations exercise the math).
    Rt = jnp.eye(4, dtype=jnp.float32) + 0.05 * jax.random.normal(k1, (4, 4), jnp.float32)
    dR = 0.1 * jax.random.normal(k2, (6,), jnp.float32)
    dt = 0.1 * jax.random.normal(k3, (3,), jnp.float32)

    out = pose_zhou_forward(Rt, dR, dt)
    out = jax.block_until_ready(out)

    ref = _reference_forward(Rt, dR, dt)
    assert out.shape == (4, 4) and out.dtype == jnp.float32
    assert jnp.allclose(out, ref, atol=1e-5, rtol=1e-5), (out, ref)

    print("KERNEL_OK")
</pallas_src>

<mosaic_0001>
module attributes {stable_mosaic.version = 11 : i64} {
  func.func @posezhou_kernel(%arg0: memref<9xf32, #tpu.memory_space<smem>>, %arg1: memref<4x4xf32, #tpu.memory_space<vmem>>, %arg2: memref<4x4xf32, #tpu.memory_space<vmem>>) attributes {dimension_semantics = [], scalar_prefetch = 0 : i64, scratch_operands = 0 : i64, tpu.core_type = #tpu.core_type<tc>} {
    %c0 = arith.constant 0 : index
    %0 = memref.load %arg0[%c0] : memref<9xf32, #tpu.memory_space<smem>>
    %1 = vector.broadcast %0 : f32 to vector<4x4xf32>
    %cst = arith.constant 1.000000e+00 : f32
    %2 = vector.broadcast %cst : f32 to vector<4x4xf32>
    %3 = arith.addf %1, %2 : vector<4x4xf32>
    %c1 = arith.constant 1 : index
    %4 = memref.load %arg0[%c1] : memref<9xf32, #tpu.memory_space<smem>>
    %5 = vector.broadcast %4 : f32 to vector<4x4xf32>
    %c2 = arith.constant 2 : index
    %6 = memref.load %arg0[%c2] : memref<9xf32, #tpu.memory_space<smem>>
    %7 = vector.broadcast %6 : f32 to vector<4x4xf32>
    %c3 = arith.constant 3 : index
    %8 = memref.load %arg0[%c3] : memref<9xf32, #tpu.memory_space<smem>>
    %9 = vector.broadcast %8 : f32 to vector<4x4xf32>
    %c4 = arith.constant 4 : index
    %10 = memref.load %arg0[%c4] : memref<9xf32, #tpu.memory_space<smem>>
    %11 = vector.broadcast %10 : f32 to vector<4x4xf32>
    %cst_0 = arith.constant 1.000000e+00 : f32
    %12 = vector.broadcast %cst_0 : f32 to vector<4x4xf32>
    %13 = arith.addf %11, %12 : vector<4x4xf32>
    %c5 = arith.constant 5 : index
    %14 = memref.load %arg0[%c5] : memref<9xf32, #tpu.memory_space<smem>>
    %15 = vector.broadcast %14 : f32 to vector<4x4xf32>
    %c6 = arith.constant 6 : index
    %16 = memref.load %arg0[%c6] : memref<9xf32, #tpu.memory_space<smem>>
    %17 = vector.broadcast %16 : f32 to vector<4x4xf32>
    %c7 = arith.constant 7 : index
    %18 = memref.load %arg0[%c7] : memref<9xf32, #tpu.memory_space<smem>>
    %19 = vector.broadcast %18 : f32 to vector<4x4xf32>
    %c8 = arith.constant 8 : index
    %20 = memref.load %arg0[%c8] : memref<9xf32, #tpu.memory_space<smem>>
    %21 = vector.broadcast %20 : f32 to vector<4x4xf32>
    %22 = arith.mulf %3, %3 : vector<4x4xf32>
    %23 = arith.mulf %5, %5 : vector<4x4xf32>
    %24 = arith.addf %22, %23 : vector<4x4xf32>
    %25 = arith.mulf %7, %7 : vector<4x4xf32>
    %26 = arith.addf %24, %25 : vector<4x4xf32>
    %27 = arith.mulf %3, %9 : vector<4x4xf32>
    %28 = arith.mulf %5, %13 : vector<4x4xf32>
    %29 = arith.addf %27, %28 : vector<4x4xf32>
    %30 = arith.mulf %7, %15 : vector<4x4xf32>
    %31 = arith.addf %29, %30 : vector<4x4xf32>
    %cst_1 = arith.constant 1.000000e-24 : f32
    %32 = vector.broadcast %cst_1 : f32 to vector<4x4xf32>
    %33 = arith.maximumf %26, %32 : vector<4x4xf32>
    %34 = arith.divf %31, %33 : vector<4x4xf32>
    %35 = arith.mulf %34, %3 : vector<4x4xf32>
    %36 = arith.subf %9, %35 : vector<4x4xf32>
    %37 = arith.mulf %34, %5 : vector<4x4xf32>
    %38 = arith.subf %13, %37 : vector<4x4xf32>
    %39 = arith.mulf %34, %7 : vector<4x4xf32>
    %40 = arith.subf %15, %39 : vector<4x4xf32>
    %41 = arith.mulf %36, %36 : vector<4x4xf32>
    %42 = arith.mulf %38, %38 : vector<4x4xf32>
    %43 = arith.addf %41, %42 : vector<4x4xf32>
    %44 = arith.mulf %40, %40 : vector<4x4xf32>
    %45 = arith.addf %43, %44 : vector<4x4xf32>
    %46 = arith.mulf %5, %40 : vector<4x4xf32>
    %47 = arith.mulf %7, %38 : vector<4x4xf32>
    %48 = arith.subf %46, %47 : vector<4x4xf32>
    %49 = arith.mulf %7, %36 : vector<4x4xf32>
    %50 = arith.mulf %3, %40 : vector<4x4xf32>
    %51 = arith.subf %49, %50 : vector<4x4xf32>
    %52 = arith.mulf %3, %38 : vector<4x4xf32>
    %53 = arith.mulf %5, %36 : vector<4x4xf32>
    %54 = arith.subf %52, %53 : vector<4x4xf32>
    %55 = math.sqrt %26 : vector<4x4xf32>
    %cst_2 = arith.constant 9.99999996E-13 : f32
    %56 = vector.broadcast %cst_2 : f32 to vector<4x4xf32>
    %57 = arith.maximumf %55, %56 : vector<4x4xf32>
    %58 = math.sqrt %45 : vector<4x4xf32>
    %cst_3 = arith.constant 9.99999996E-13 : f32
    %59 = vector.broadcast %cst_3 : f32 to vector<4x4xf32>
    %60 = arith.maximumf %58, %59 : vector<4x4xf32>
    %61 = tpu.iota {dimensions = array<i32: 1>} : vector<4x4xi32>
    %62 = tpu.iota {dimensions = array<i32: 0>} : vector<4x4xi32>
    %c0_i32 = arith.constant 0 : i32
    %63 = vector.broadcast %c0_i32 : i32 to vector<4x4xi32>
    %64 = arith.cmpi eq, %62, %63 : vector<4x4xi32>
    %c0_i32_4 = arith.constant 0 : i32
    %65 = vector.broadcast %c0_i32_4 : i32 to vector<4x4xi32>
    %66 = arith.cmpi eq, %61, %65 : vector<4x4xi32>
    %c1_i32 = arith.constant 1 : i32
    %67 = vector.broadcast %c1_i32 : i32 to vector<4x4xi32>
    %68 = arith.cmpi eq, %61, %67 : vector<4x4xi32>
    %c2_i32 = arith.constant 2 : i32
    %69 = vector.broadcast %c2_i32 : i32 to vector<4x4xi32>
    %70 = arith.cmpi eq, %61, %69 : vector<4x4xi32>
    %71 = arith.select %70, %7, %17 : vector<4x4xi1>, vector<4x4xf32>
    %72 = arith.select %68, %5, %71 : vector<4x4xi1>, vector<4x4xf32>
    %73 = arith.select %66, %3, %72 : vector<4x4xi1>, vector<4x4xf32>
    %c1_i32_5 = arith.constant 1 : i32
    %74 = vector.broadcast %c1_i32_5 : i32 to vector<4x4xi32>
    %75 = arith.cmpi eq, %62, %74 : vector<4x4xi32>
    %c0_i32_6 = arith.constant 0 : i32
    %76 = vector.broadcast %c0_i32_6 : i32 to vector<4x4xi32>
    %77 = arith.cmpi eq, %61, %76 : vector<4x4xi32>
    %c1_i32_7 = arith.constant 1 : i32
    %78 = vector.broadcast %c1_i32_7 : i32 to vector<4x4xi32>
    %79 = arith.cmpi eq, %61, %78 : vector<4x4xi32>
    %c2_i32_8 = arith.constant 2 : i32
    %80 = vector.broadcast %c2_i32_8 : i32 to vector<4x4xi32>
    %81 = arith.cmpi eq, %61, %80 : vector<4x4xi32>
    %82 = arith.select %81, %40, %19 : vector<4x4xi1>, vector<4x4xf32>
    %83 = arith.select %79, %38, %82 : vector<4x4xi1>, vector<4x4xf32>
    %84 = arith.select %77, %36, %83 : vector<4x4xi1>, vector<4x4xf32>
    %c2_i32_9 = arith.constant 2 : i32
    %85 = vector.broadcast %c2_i32_9 : i32 to vector<4x4xi32>
    %86 = arith.cmpi eq, %62, %85 : vector<4x4xi32>
    %c0_i32_10 = arith.constant 0 : i32
    %87 = vector.broadcast %c0_i32_10 : i32 to vector<4x4xi32>
    %88 = arith.cmpi eq, %61, %87 : vector<4x4xi32>
    %c1_i32_11 = arith.constant 1 : i32
    %89 = vector.broadcast %c1_i32_11 : i32 to vector<4x4xi32>
    %90 = arith.cmpi eq, %61, %89 : vector<4x4xi32>
    %c2_i32_12 = arith.constant 2 : i32
    %91 = vector.broadcast %c2_i32_12 : i32 to vector<4x4xi32>
    %92 = arith.cmpi eq, %61, %91 : vector<4x4xi32>
    %93 = arith.select %92, %54, %21 : vector<4x4xi1>, vector<4x4xf32>
    %94 = arith.select %90, %51, %93 : vector<4x4xi1>, vector<4x4xf32>
    %95 = arith.select %88, %48, %94 : vector<4x4xi1>, vector<4x4xf32>
    %c3_i32 = arith.constant 3 : i32
    %96 = vector.broadcast %c3_i32 : i32 to vector<4x4xi32>
    %97 = arith.cmpi eq, %61, %96 : vector<4x4xi32>
    %cst_13 = arith.constant 1.000000e+00 : f32
    %cst_14 = arith.constant 0.000000e+00 : f32
    %98 = vector.broadcast %cst_13 : f32 to vector<4x4xf32>
    %99 = vector.broadcast %cst_14 : f32 to vector<4x4xf32>
    %100 = arith.select %97, %98, %99 : vector<4x4xi1>, vector<4x4xf32>
    %101 = arith.select %86, %95, %100 : vector<4x4xi1>, vector<4x4xf32>
    %102 = arith.select %75, %84, %101 : vector<4x4xi1>, vector<4x4xf32>
    %103 = arith.select %64, %73, %102 : vector<4x4xi1>, vector<4x4xf32>
    %c0_i32_15 = arith.constant 0 : i32
    %104 = vector.broadcast %c0_i32_15 : i32 to vector<4x4xi32>
    %105 = arith.cmpi eq, %62, %104 : vector<4x4xi32>
    %c1_i32_16 = arith.constant 1 : i32
    %106 = vector.broadcast %c1_i32_16 : i32 to vector<4x4xi32>
    %107 = arith.cmpi eq, %62, %106 : vector<4x4xi32>
    %c2_i32_17 = arith.constant 2 : i32
    %108 = vector.broadcast %c2_i32_17 : i32 to vector<4x4xi32>
    %109 = arith.cmpi eq, %62, %108 : vector<4x4xi32>
    %110 = arith.mulf %57, %60 : vector<4x4xf32>
    %cst_18 = arith.constant 1.000000e+00 : f32
    %111 = vector.broadcast %cst_18 : f32 to vector<4x4xf32>
    %112 = arith.select %109, %110, %111 : vector<4x4xi1>, vector<4x4xf32>
    %113 = arith.select %107, %60, %112 : vector<4x4xi1>, vector<4x4xf32>
    %114 = arith.select %105, %57, %113 : vector<4x4xi1>, vector<4x4xf32>
    %c3_i32_19 = arith.constant 3 : i32
    %115 = vector.broadcast %c3_i32_19 : i32 to vector<4x4xi32>
    %116 = arith.cmpi eq, %61, %115 : vector<4x4xi32>
    %cst_20 = arith.constant 1.000000e+00 : f32
    %117 = vector.broadcast %cst_20 : f32 to vector<4x4xf32>
    %118 = arith.select %116, %117, %114 : vector<4x4xi1>, vector<4x4xf32>
    %119 = arith.divf %103, %118 : vector<4x4xf32>
    %c0_21 = arith.constant 0 : index
    %c0_22 = arith.constant 0 : index
    %120 = vector.load %arg1[%c0_21, %c0_22] : memref<4x4xf32, #tpu.memory_space<vmem>>, vector<4x4xf32>
    %121 = vector.extract_strided_slice %120 {offsets = [0, 0], sizes = [4, 1], strides = [1, 1]} : vector<4x4xf32> to vector<4x1xf32>
    %122 = vector.extract_strided_slice %119 {offsets = [0, 0], sizes = [1, 4], strides = [1, 1]} : vector<4x4xf32> to vector<1x4xf32>
    %123 = vector.broadcast %121 : vector<4x1xf32> to vector<4x4xf32>
    %124 = vector.broadcast %122 : vector<1x4xf32> to vector<4x4xf32>
    %125 = arith.mulf %123, %124 : vector<4x4xf32>
    %126 = vector.extract_strided_slice %120 {offsets = [0, 1], sizes = [4, 1], strides = [1, 1]} : vector<4x4xf32> to vector<4x1xf32>
    %127 = vector.extract_strided_slice %119 {offsets = [1, 0], sizes = [1, 4], strides = [1, 1]} : vector<4x4xf32> to vector<1x4xf32>
    %128 = vector.broadcast %126 : vector<4x1xf32> to vector<4x4xf32>
    %129 = vector.broadcast %127 : vector<1x4xf32> to vector<4x4xf32>
    %130 = arith.mulf %128, %129 : vector<4x4xf32>
    %131 = arith.addf %125, %130 : vector<4x4xf32>
    %132 = vector.extract_strided_slice %120 {offsets = [0, 2], sizes = [4, 1], strides = [1, 1]} : vector<4x4xf32> to vector<4x1xf32>
    %133 = vector.extract_strided_slice %119 {offsets = [2, 0], sizes = [1, 4], strides = [1, 1]} : vector<4x4xf32> to vector<1x4xf32>
    %134 = vector.broadcast %132 : vector<4x1xf32> to vector<4x4xf32>
    %135 = vector.broadcast %133 : vector<1x4xf32> to vector<4x4xf32>
    %136 = arith.mulf %134, %135 : vector<4x4xf32>
    %137 = arith.addf %131, %136 : vector<4x4xf32>
    %138 = vector.extract_strided_slice %120 {offsets = [0, 3], sizes = [4, 1], strides = [1, 1]} : vector<4x4xf32> to vector<4x1xf32>
    %139 = vector.extract_strided_slice %119 {offsets = [3, 0], sizes = [1, 4], strides = [1, 1]} : vector<4x4xf32> to vector<1x4xf32>
    %140 = vector.broadcast %138 : vector<4x1xf32> to vector<4x4xf32>
    %141 = vector.broadcast %139 : vector<1x4xf32> to vector<4x4xf32>
    %142 = arith.mulf %140, %141 : vector<4x4xf32>
    %143 = arith.addf %137, %142 : vector<4x4xf32>
    %c0_23 = arith.constant 0 : index
    %c0_24 = arith.constant 0 : index
    %144 = vector.load %arg2[%c0_23, %c0_24] : memref<4x4xf32, #tpu.memory_space<vmem>>, vector<4x4xf32>
    tpu.vector_store %arg2[%c0_23, %c0_24], %143 {strides = array<i32>} : memref<4x4xf32, #tpu.memory_space<vmem>>, vector<4x4xf32>,
    return
  }
}

</mosaic_0001>

<bundles_post_ra>
// kernel: pose_zhou_forward.1
= control target key start
LH: loop header
LB: loop body
LE: loop exit
PB: predicated region body
PF: predicated region fallthrough
CT: control target
= control target key end

     0   :  { %7 = vsyncpa [#allocation5], 0  ;;  %s382_s0 = inlined_call_operand.vmem [shape: f32[9], index: 0, kind: input, shape index: {}]   ;;  %s383_s1 = inlined_call_operand.hbm [shape: f32[4,4], index: 1, kind: input, shape index: {}]   ;;  %s384_s2 = inlined_call_operand.hbm [shape: f32[4,4], index: 2, kind: output, shape index: {}]  }
   0x1   :  { %8 = vsyncpa [#allocation3], 0 }
   0x2   :  { %9 = vsyncpa [#allocation4], 0  ;;  %s16_s11 = sshll.u32 %s382_s0, 4  ;;  %s17_s11 = int_to_ptr.vmem [resolvable:$true] %s16_s11 }
   0x3   :  { %s225_s12 = scalar_lea.vmem %s17_s11, 16  ;;  %p230_p1 = scmp.lt.s32.totalorder %s17_s11, %s17_s11 }
   0x4   :  { %p226_p0 = scmp.ne.s32.totalorder %s17_s11, %s225_s12  ;;  %p231_p2 = scmp.lt.s32.totalorder %s225_s12, %s225_s12 }
   0x6   :  { %p232_p3 = por %p231_p2, %p230_p1 }
   0x8   :  { %p233_p4 = pnand %p232_p3, %p226_p0 }
   0xa   :  { %236 = shalt.err (!%p233_p4)
}
   0xb   :  { %s287_s13 = smov [#allocation2]   ;;  %s288_s14 = smov [#allocation6]  }
   0xc   :  { %19 = dma.vmem_to_smem %s17_s11, 16, %s287_s13, [#allocation5]  }
   0xd   :  { %s26_s15 = sshll.u32 %s288_s14, 4  ;;  %s237_s18 = scalar_lea.hbm %s383_s1, 64  ;;  %s27_s15 = int_to_ptr.vmem [resolvable:$true] %s26_s15 }
   0xe   :  { %p238_p5 = scmp.ne.s32.totalorder %s383_s1, %s237_s18  ;;  %p241_p6 = scmp.lt.u32.totalorder %s237_s18, %s383_s1 }
  0x10   :  { %p243_p7 = pnand %p241_p6, %p238_p5 }
  0x12   :  { %246 = shalt.err (!%p243_p7)
}
  0x13   :  { %s247_s22 = scalar_lea.vmem %s27_s15, 64  ;;  %p252_p9 = scmp.lt.s32.totalorder %s27_s15, %s27_s15 }
  0x14   :  { %p248_p8 = scmp.ne.s32.totalorder %s27_s15, %s247_s22  ;;  %p253_p10 = scmp.lt.s32.totalorder %s247_s22, %s247_s22 }
  0x16   :  { %p254_p11 = por %p253_p10, %p252_p9 }
  0x18   :  { %p255_p12 = pnand %p254_p11, %p248_p8 }
  0x1a   :  { %258 = shalt.err (!%p255_p12)
}
  0x1b   :  { %29 = dma.hbm_to_vmem [thread:$0]  %s383_s1, 64, %s27_s15, [#allocation3]  }
  0x1c   :  { %281 = dma.done.wait [#allocation5], 16  }
  0x1d   :  { %282 = vsyncadd [#allocation5], 4294967280 }
  0x1e   :  { %283 = dma.done.wait [#allocation3], 64  }
  0x1f   :  { %284 = vsyncadd [#allocation3], 4294967232 }
  0x20   :  { %36 = sfence }
  0x21   :  { %v137_v0 = vld [vmem:[#allocation6] sm:$0xf]  ;;  %v289_v1 = vmov 0   ;;  %v290_v2 = vmov 2   ;;  %s37_s25 = sld [smem:[#allocation2]]  ;;  %v291_v3 = vmov 1   ;;  %v106_v47 = vlaneseq }
  0x22   :  { %212 = vset.pattern.permute.xlu0 %v289_v1  ;;  %214 = vset.pattern.permute.xlu1 %v290_v2  ;;  %v292_v4 = vmov 3   ;;  %s196_s1 = sld [smem:[#allocation2 + $0x1]]  ;;  %s197_s26 = sld [smem:[#allocation2 + $0x2]]  ;;  %vm178_vm11 = vcmask 27648  }
  0x23   :  { %140 = vperm.xlu0 %212, %v137_v0   ;;  %159 = vperm.xlu1 %214, %v137_v0   ;;  %s199_s27 = sld [smem:[#allocation2 + $0x4]]  ;;  %s198_s28 = sld [smem:[#allocation2 + $0x3]]  ;;  %v109_v50 = vshrl.u32 %v106_v47, 7  ;;  %v107_v57 = vand.u32 127, %v106_v47 }
  0x24   :  { %s200_s29 = sld [smem:[#allocation2 + $0x5]]  ;;  %s203_s30 = sld [smem:[#allocation2 + $0x8]] }
  0x25   :  { %vm121_vm4 = vcmp.eq.s32.totalorder %v109_v50, 2  ;;  %s202_s3 = sld [smem:[#allocation2 + $0x7]]  ;;  %vm117_vm5 = vcmp.eq.s32.totalorder %v109_v50, 1  ;;  %s201_s4 = sld [smem:[#allocation2 + $0x6]]  ;;  %vm110_vm6 = vcmp.eq.s32.totalorder %v109_v50, 0  ;;  %vm113_vm7 = vcmp.eq.s32.totalorder %v107_v57, 2 }
  0x26   :  { %vm125_vm8 = vcmp.eq.s32.totalorder %v107_v57, 3  ;;  %vm112_vm9 = vcmp.eq.s32.totalorder %v107_v57, 1  ;;  %vm111_vm10 = vcmp.eq.s32.totalorder %v107_v57, 0  ;;  %s294_s5 = smov [#allocation7]  }
  0x27   :  { %213 = vset.pattern.permute.xlu0 %v291_v3  ;;  %215 = vset.pattern.permute.xlu1 %v292_v4  ;;  %v38_v5 = vstv %s37_s25  ;;  %s186_s6 = sshll.u32 %s294_s5, 4  ;;  %s187_s6 = int_to_ptr.vmem [resolvable:$true] %s186_s6 }
  0x28   :  { %149 = vperm.xlu0 %213, %v137_v0   ;;  %169 = vperm.xlu1 %215, %v137_v0   ;;  %v325_v6 = vadd.f32 1.0, %v38_v5  ;;  %v327_v7 = vstv %s196_s1  ;;  %v333_v10 = vstv %s197_s26  ;;  %s259_s7 = scalar_lea.vmem %s187_s6, 64  ;;  %p264_p0 = scmp.lt.s32.totalorder %s187_s6, %s187_s6 }
  0x29   :  { %v58_v9 = vmul.f32 %v327_v7, %v327_v7  ;;  %v60_v12 = vmul.f32 %v333_v10, %v333_v10  ;;  %v47_v14 = vstv %s199_s27  ;;  %v45_v17 = vstv %s198_s28  ;;  %p260_p13 = scmp.ne.s32.totalorder %s187_s6, %s259_s7  ;;  %p265_p1 = scmp.lt.s32.totalorder %s259_s7, %s259_s7 }
  0x2a   :  { %v57_v8 = vmul.f32 %v325_v6, %v325_v6  ;;  %v48_v16 = vadd.f32 1.0, %v47_v14  ;;  %v62_v18 = vmul.f32 %v45_v17, %v325_v6  ;;  %v50_v20 = vstv %s200_s29 }
  0x2b   :  { %v65_v22 = vmul.f32 %v50_v20, %v333_v10  ;;  %v56_v60 = vstv %s203_s30  ;;  %v54_v1 = vstv %s202_s3  ;;  %v52_v5 = vstv %s201_s4  ;;  %p266_p2 = por %p265_p1, %p264_p0 }
  0x2c   :  { %216 = vset.pattern.permute.xlu0 %v292_v4  ;;  %v59_v11 = vadd.f32 %v58_v9, %v57_v8  ;;  %v63_v19 = vmul.f32 %v48_v16, %v327_v7  ;;  %v293_v14 = vmov 0.0  }
  0x2d   :  { %p267_p3 = pnand %p266_p2, %p260_p13 }
  0x2e   :  { %v61_v13 = vadd.f32 %v60_v12, %v59_v11  ;;  %v64_v21 = vadd.f32 %v63_v19, %v62_v18  ;;  %v114_v11 = vsel %vm113_vm7, %v333_v10, %v52_v5 }
  0x30   :  { %v67_v15 = vmax.f32 %v61_v13, 1e-24  ;;  %v66_v23 = vadd.f32 %v65_v22, %v64_v21  ;;  %vm92_vm0 = vcmp.eq.f32.partialorder %v61_v13, inf  ;;  %v95_v41 = vand.u32 2147483648, %v61_v13 }
  0x31   :  { %vm94_vm2 = vcmp.eq.f32.partialorder %v61_v13, 0.0 }
  0x32   :  { %217 = vrcp.f32 %v67_v15  ;;  %v126_v15 = vsel %vm125_vm8, 1.0, %v293_v14 }
  0x33   :  { %219 = vrsqrt.f32 %v61_v13 }
  0x3c   :  { %v218_v24 = vpop.eup %217 }
  0x3d   :  { %v69_v25 = vmul.f32 %v218_v24, %v66_v23  ;;  %v220_v37 = vpop.eup %219  ;;  %v154_v24 = vsub.s32 1, %v109_v50 }
  0x3e   :  { %v91_v39 = vmul.f32 %v220_v37, %v61_v13 }
  0x3f   :  { %v70_v26 = vmul.f32 %v69_v25, %v325_v6  ;;  %v72_v27 = vmul.f32 %v69_v25, %v327_v7  ;;  %v74_v30 = vmul.f32 %v69_v25, %v333_v10 }
  0x40   :  { %v93_v43 = vsel %vm92_vm0, %v61_v13, %v91_v39 }
  0x41   :  { %v342_v28 = vsub.f32 %v45_v17, %v70_v26  ;;  %v73_v29 = vsub.f32 %v48_v16, %v72_v27  ;;  %v75_v31 = vsub.f32 %v50_v20, %v74_v30  ;;  %v96_v45 = vsel %vm94_vm2, %v95_v41, %v93_v43 }
  0x42   :  { %v97_v48 = vmax.f32 %v96_v45, 1e-12  ;;  %v115_v16 = vsel %vm112_vm9, %v327_v7, %v114_v11  ;;  %v164_v27 = vsub.s32 2, %v109_v50 }
  0x43   :  { %v76_v32 = vmul.f32 %v342_v28, %v342_v28  ;;  %v77_v33 = vmul.f32 %v73_v29, %v73_v29  ;;  %v79_v35 = vmul.f32 %v75_v31, %v75_v31  ;;  %v87_v52 = vmul.f32 %v73_v29, %v325_v6 }
  0x44   :  { %v88_v53 = vmul.f32 %v342_v28, %v327_v7  ;;  %v84_v55 = vmul.f32 %v342_v28, %v333_v10  ;;  %v85_v56 = vmul.f32 %v75_v31, %v325_v6  ;;  %v81_v61 = vmul.f32 %v75_v31, %v327_v7 }
  0x45   :  { %v78_v34 = vadd.f32 %v77_v33, %v76_v32  ;;  %v82_v62 = vmul.f32 %v73_v29, %v333_v10  ;;  %v118_v8 = vsel %vm113_vm7, %v75_v31, %v54_v1  ;;  %v116_v19 = vsel %vm111_vm10, %v325_v6, %v115_v16 }
  0x46   :  { %v89_v58 = vsub.f32 %v87_v52, %v88_v53  ;;  %v86_v63 = vsub.f32 %v84_v55, %v85_v56  ;;  %v119_v12 = vsel %vm112_vm9, %v73_v29, %v118_v8  ;;  %v145_v10 = vsub.s32 0, %v109_v50 }
  0x47   :  { %v80_v36 = vadd.f32 %v79_v35, %v78_v34  ;;  %v83_v3 = vsub.f32 %v81_v61, %v82_v62  ;;  %v120_v17 = vsel %vm111_vm10, %v342_v28, %v119_v12  ;;  %v174_v29 = vsub.s32 3, %v109_v50 }
  0x48   :  { %v122_v2 = vsel %vm113_vm7, %v89_v58, %v56_v60 }
  0x49   :  { %221 = vrsqrt.f32 %v80_v36  ;;  %vm100_vm1 = vcmp.eq.f32.partialorder %v80_v36, inf  ;;  %v103_v42 = vand.u32 2147483648, %v80_v36  ;;  %vm102_vm3 = vcmp.eq.f32.partialorder %v80_v36, 0.0 }
  0x4a   :  { %v123_v9 = vsel %vm112_vm9, %v86_v63, %v122_v2 }
  0x4b   :  { %v124_v13 = vsel %vm111_vm10, %v83_v3, %v123_v9 }
  0x4c   :  { %v127_v18 = vsel %vm121_vm4, %v124_v13, %v126_v15 }
  0x4d   :  { %v128_v20 = vsel %vm117_vm5, %v120_v17, %v127_v18 }
  0x4e   :  { %v129_v22 = vsel %vm110_vm6, %v116_v19, %v128_v20 }
  0x53   :  { %v222_v38 = vpop.eup %221 }
  0x54   :  { %v99_v40 = vmul.f32 %v222_v38, %v80_v36 }
  0x56   :  { %v101_v44 = vsel %vm100_vm1, %v80_v36, %v99_v40 }
  0x57   :  { %v104_v46 = vsel %vm102_vm3, %v103_v42, %v101_v44 }
  0x58   :  { %v105_v49 = vmax.f32 %v104_v46, 1e-12 }
  0x5a   :  { %v130_v51 = vmul.f32 %v105_v49, %v97_v48 }
  0x5c   :  { %v131_v54 = vsel %vm121_vm4, %v130_v51, 1.0 }
  0x5d   :  { %v132_v59 = vsel %vm117_vm5, %v105_v49, %v131_v54 }
  0x5e   :  { %v133_v0 = vsel %vm110_vm6, %v97_v48, %v132_v59 }
  0x5f   :  { %v134_v4 = vsel %vm125_vm8, 1.0, %v133_v0 }
  0x60   :  { %223 = vrcp.f32 %v134_v4 }
  0x6a   :  { %v224_v21 = vpop.eup %223 }
  0x6b   :  { %v136_v23 = vmul.f32 %v224_v21, %v129_v22 }
  0x6d   :  { %v146_v30 = vrot.slane %v136_v23, %v145_v10  ;;  %v155_v7 = vrot.slane %v136_v23, %v154_v24  ;;  %v165_v31 = vrot.slane %v136_v23, %v164_v27  ;;  %v175_v28 = vrot.slane %v136_v23, %v174_v29 }
  0xa2   :  { %v141_v25 = vpop.permute.xlu0 %140  ;;  %v160_v26 = vpop.permute.xlu1 %159 }
  0xa3   :  { %v147_v34 = vmul.f32 %v146_v30, %v141_v25  ;;  %v166_v35 = vmul.f32 %v165_v31, %v160_v26 }
  0xa7   :  { %v150_v32 = vpop.permute.xlu0 %149  ;;  %v170_v33 = vpop.permute.xlu1 %169 }
  0xa8   :  { %v156_v6 = vmul.f32 %v155_v7, %v150_v32  ;;  %v176_v37 = vmul.f32 %v175_v28, %v170_v33 }
  0xaa   :  { %v157_v36 = vadd.f32 %v156_v6, %v147_v34 }
  0xac   :  { %v167_v38 = vadd.f32 %v166_v35, %v157_v36 }
  0xae   :  { %v177_v39 = vadd.f32 %v176_v37, %v167_v38 }
  0xb0   :  { %179 = vst.msk [vmem:[#allocation7] sm:$0xf] %vm178_vm11, %v177_v39 }
  0xb1   :  { %270 = shalt.err (!%p267_p3)
}
  0xb2   :  { %s271_s10 = scalar_lea.hbm %s384_s2, 64 }
  0xb3   :  { %p272_p4 = scmp.ne.s32.totalorder %s384_s2, %s271_s10  ;;  %p275_p5 = scmp.lt.u32.totalorder %s271_s10, %s384_s2 }
  0xb5   :  { %p277_p6 = pnand %p275_p5, %p272_p4 }
  0xb7   :  { %280 = shalt.err (!%p277_p6)
}
  0xb8   :  { %189 = dma.vmem_to_hbm [thread:$0]  %s187_s6, 64, %s384_s2, [#allocation4]  }
  0xb9   :  { %285 = dma.done.wait [#allocation4], 64  }
  0xba   :  { %286 = vsyncadd [#allocation4], 4294967232 }
  0xbb   :  { %193 = vsyncpa [#allocation3], 1 }
  0xbc   :  { %194 = vsyncpa [#allocation4], 1 }
  0xbd   :  { %195 = vsyncpa [#allocation5], 1 }

</bundles_post_ra>
